<compile_context>
chip_gen: v7x
topology: tpu7x:2x2x1
jax: 0.10.0
libtpu: 0.0.40
codegen_flags: <defaults>
</compile_context>

<pallas_src>
import jax
import jax.numpy as jnp
from jax.experimental import pallas as pl
from jax.experimental.pallas import tpu as pltpu


def _ddp_replica_kernel(x_ref, w1_ref, b1_ref, w2_ref, b2_ref, o_ref):
    # One grid step == one batch tile (covers one or more logical DDP device
    # chunks; identical params => identical math).
    x = x_ref[...].astype(jnp.bfloat16)                          # in-kernel cast
    h = jnp.dot(x, w1_ref[...], preferred_element_type=jnp.float32)
    h = jnp.maximum(h + b1_ref[...], 0.0)                        # f32 epilogue
    y = jnp.dot(h.astype(jnp.bfloat16), w2_ref[...],
                preferred_element_type=jnp.float32)
    o_ref[...] = (y + b2_ref[...]).astype(o_ref.dtype)


def _round_up(v, m):
    return (v + m - 1) // m * m


def prepare_ddp_params(w1, b1, w2, b2):
    """One-time parameter prep (the DDP __init__ / _sync_params analogue).

    Pads feature dims to multiples of 128 (lane-dense, MXU-native) and casts
    matmul operands to bf16.  Done once at init so steady-state forwards do no
    parameter padding/cast traffic.
    """
    D_in, D_hid = w1.shape
    D_out = w2.shape[1]
    Din_p = _round_up(D_in, 128)
    Dhid_p = _round_up(D_hid, 128)
    Dout_p = _round_up(D_out, 128)

    w1_p = jnp.zeros((Din_p, Dhid_p), jnp.bfloat16).at[:D_in, :D_hid].set(
        w1.astype(jnp.bfloat16))
    b1_p = jnp.zeros((1, Dhid_p), jnp.float32).at[:, :D_hid].set(
        b1.reshape(1, -1).astype(jnp.float32))
    w2_p = jnp.zeros((Dhid_p, Dout_p), jnp.bfloat16).at[:D_hid, :D_out].set(
        w2.astype(jnp.bfloat16))
    b2_p = jnp.zeros((1, Dout_p), jnp.float32).at[:, :D_out].set(
        b2.reshape(1, -1).astype(jnp.float32))
    return {"w1": w1_p, "b1": b1_p, "w2": w2_p, "b2": b2_p,
            "dims": (D_in, D_hid, D_out)}


def ddp_forward(x, params, *, num_devices, tile_m=256, out_dtype=jnp.bfloat16):
    """Emulates DistributedDataParallel.forward for a 2-layer MLP module.

    x: (N, D_in) float32; N must be an integer multiple of num_devices
    (the same constraint DDP imposes on the batch size).
    params: output of prepare_ddp_params (padded bf16 weights, f32 biases).
    """
    N, D_in = x.shape
    D_in_orig, D_hid, D_out = params["dims"]
    assert D_in == D_in_orig, "input feature dim mismatch vs prepared params"
    assert N % num_devices == 0, "batch must be a multiple of num_devices"

    w1_p, b1_p, w2_p, b2_p = params["w1"], params["b1"], params["w2"], params["b2"]
    Din_p, Dhid_p = w1_p.shape
    Dout_p = w2_p.shape[1]

    # Tile choice: one full-extent block for small batches; >=2 steps of
    # tile_m rows for large batches (feeds both v7x TensorCores via the
    # "parallel" grid axis).
    if N <= tile_m:
        tile_m = _round_up(N, 8)
    N_p = _round_up(N, tile_m)

    # Scatter input: only materialize a padded copy when padding is actually
    # required.  In the aligned (production) case x goes straight through as
    # f32 and is cast to bf16 inside the kernel (hidden under the MXU).
    if N_p == N and Din_p == D_in:
        x_in = x
    else:
        x_in = jnp.zeros((N_p, Din_p), jnp.bfloat16).at[:N, :D_in].set(
            x.astype(jnp.bfloat16))
    x_bytes = jnp.dtype(x_in.dtype).itemsize
    out_bytes = jnp.dtype(out_dtype).itemsize

    grid = (N_p // tile_m,)

    in_specs = [
        # scatter: each grid step gets its own lane-dense batch tile
        pl.BlockSpec((tile_m, Din_p), lambda i: (i, 0)),
        # _sync_params: identical parameter blocks broadcast to every step;
        # constant block index => single-buffer (no overlap benefit from 2x)
        pl.BlockSpec((Din_p, Dhid_p), lambda i: (0, 0),
                     pipeline_mode=pl.Buffered(1)),
        pl.BlockSpec((1, Dhid_p), lambda i: (0, 0),
                     pipeline_mode=pl.Buffered(1)),
        pl.BlockSpec((Dhid_p, Dout_p), lambda i: (0, 0),
                     pipeline_mode=pl.Buffered(1)),
        pl.BlockSpec((1, Dout_p), lambda i: (0, 0),
                     pipeline_mode=pl.Buffered(1)),
    ]
    # gather: each tile's output is written back to its batch slot (lane-dense)
    out_spec = pl.BlockSpec((tile_m, Dout_p), lambda i: (i, 0))

    flops = 2 * N_p * (Din_p * Dhid_p + Dhid_p * Dout_p)
    bytes_accessed = (
        x_in.size * x_bytes
        + w1_p.size * 2 + w2_p.size * 2            # bf16 weights (fetched once)
        + b1_p.size * 4 + b2_p.size * 4            # f32 biases
        + N_p * Dout_p * out_bytes                 # output writeback
    )

    # VMEM budget: 2x-buffered x tile + 2x-buffered out tile + single-buffered
    # weights + f32 intermediate h.  Raise the scoped limit only when needed
    # (cap at 64 MiB so v7x never over-commits).
    vmem_needed = (2 * tile_m * Din_p * x_bytes
                   + 2 * tile_m * Dout_p * out_bytes
                   + w1_p.size * 2 + w2_p.size * 2
                   + b1_p.size * 4 + b2_p.size * 4
                   + tile_m * Dhid_p * 4)
    vmem_limit = None
    if vmem_needed + vmem_needed // 4 > 32 * 1024 * 1024:
        vmem_limit = min(vmem_needed + vmem_needed // 4, 64 * 1024 * 1024)

    out_p = pl.pallas_call(
        _ddp_replica_kernel,
        out_shape=jax.ShapeDtypeStruct((N_p, Dout_p), out_dtype),
        grid_spec=pltpu.PrefetchScalarGridSpec(
            num_scalar_prefetch=0,
            grid=grid,
            in_specs=in_specs,
            out_specs=out_spec,
        ),
        compiler_params=pltpu.CompilerParams(
            # parallel_apply across batch tiles -> independent grid steps
            dimension_semantics=("parallel",),
            vmem_limit_bytes=vmem_limit,
        ),
        cost_estimate=pl.CostEstimate(
            flops=flops, transcendentals=0, bytes_accessed=bytes_accessed),
    )(x_in, w1_p, b1_p, w2_p, b2_p)

    # gather: slice padding back off only when padding was applied (padded
    # rows/lanes are never exposed downstream).
    if N_p == N and Dout_p == D_out:
        return out_p
    return out_p[:N, :D_out]


def _reference(x, w1, b1, w2, b2):
    h = jnp.maximum(x @ w1 + b1, 0.0)
    return h @ w2 + b2


if __name__ == "__main__":
    # Small shapes: batch=32 scattered across 4 logical "devices",
    # wrapped module: Linear(32 -> 64) + ReLU + Linear(64 -> 32).
    N, D_in, D_hid, D_out = 32, 32, 64, 32
    NUM_DEVICES = 4

    key = jax.random.PRNGKey(0)
    kx, k1, k2, k3, k4 = jax.random.split(key, 5)

    x = jax.random.normal(kx, (N, D_in), dtype=jnp.float32)

    # Deterministic parameter init (PyTorch Linear-style uniform bounds).
    bound1 = 1.0 / (D_in ** 0.5)
    bound2 = 1.0 / (D_hid ** 0.5)
    w1 = jax.random.uniform(k1, (D_in, D_hid), jnp.float32, -bound1, bound1)
    b1 = jax.random.uniform(k2, (1, D_hid), jnp.float32, -bound1, bound1)
    w2 = jax.random.uniform(k3, (D_hid, D_out), jnp.float32, -bound2, bound2)
    b2 = jax.random.uniform(k4, (1, D_out), jnp.float32, -bound2, bound2)

    # Init-time parameter prep (padding + bf16 cast done once, not per forward).
    params = prepare_ddp_params(w1, b1, w2, b2)

    out = ddp_forward(x, params, num_devices=NUM_DEVICES)
    out = jax.block_until_ready(out)

    ref = _reference(x, w1, b1, w2, b2)
    assert out.shape == (N, D_out)
    # bf16 matmul operands + bf16 output with f32 accumulation -> relaxed tol
    assert jnp.allclose(out.astype(jnp.float32), ref, atol=3e-2, rtol=3e-2), \
        "mismatch vs reference"

    print("KERNEL_OK")
</pallas_src>

<mosaic_0001>
module attributes {stable_mosaic.version = 11 : i64} {
  func.func @_ddp_replica_kernel(%arg0: i32, %arg1: memref<32x128xbf16, #tpu.memory_space<vmem>>, %arg2: memref<128x128xbf16, #tpu.memory_space<vmem>>, %arg3: memref<1x128xf32, #tpu.memory_space<vmem>>, %arg4: memref<128x128xbf16, #tpu.memory_space<vmem>>, %arg5: memref<1x128xf32, #tpu.memory_space<vmem>>, %arg6: memref<32x128xbf16, #tpu.memory_space<vmem>>) attributes {dimension_semantics = [#tpu.dimension_semantics<parallel>], iteration_bounds = array<i64: 1>, scalar_prefetch = 0 : i64, scratch_operands = 0 : i64, tpu.core_type = #tpu.core_type<tc>, window_params = [{transform_indices = @transform_0, window_bounds = array<i64: 32, 128>}, {pipeline_mode = #tpu.pipeline_mode<synchronous>, transform_indices = @transform_1, window_bounds = array<i64: 128, 128>}, {pipeline_mode = #tpu.pipeline_mode<synchronous>, transform_indices = @transform_2, window_bounds = array<i64: 1, 128>}, {pipeline_mode = #tpu.pipeline_mode<synchronous>, transform_indices = @transform_3, window_bounds = array<i64: 128, 128>}, {pipeline_mode = #tpu.pipeline_mode<synchronous>, transform_indices = @transform_4, window_bounds = array<i64: 1, 128>}, {transform_indices = @transform_5, window_bounds = array<i64: 32, 128>}]} {
    %c0 = arith.constant 0 : index
    %c0_0 = arith.constant 0 : index
    %0 = vector.load %arg1[%c0, %c0_0] : memref<32x128xbf16, #tpu.memory_space<vmem>>, vector<32x128xbf16>
    %c0_1 = arith.constant 0 : index
    %c0_2 = arith.constant 0 : index
    %1 = vector.load %arg2[%c0_1, %c0_2] : memref<128x128xbf16, #tpu.memory_space<vmem>>, vector<128x128xbf16>
    %cst = arith.constant dense<0.000000e+00> : vector<32x128xf32>
    %2 = tpu.matmul %0, %1, %cst {dimension_numbers = #tpu.dot_dimension_numbers<[1], [0], [0], [1], [0, 0, 1, 1], [], []>} : vector<32x128xbf16>, vector<128x128xbf16>, vector<32x128xf32> -> vector<32x128xf32>
    %c0_3 = arith.constant 0 : index
    %c0_4 = arith.constant 0 : index
    %3 = vector.load %arg3[%c0_3, %c0_4] : memref<1x128xf32, #tpu.memory_space<vmem>>, vector<1x128xf32>
    %4 = vector.broadcast %3 : vector<1x128xf32> to vector<32x128xf32>
    %5 = arith.addf %2, %4 : vector<32x128xf32>
    %cst_5 = arith.constant 0.000000e+00 : f32
    %6 = vector.broadcast %cst_5 : f32 to vector<32x128xf32>
    %7 = arith.maximumf %5, %6 : vector<32x128xf32>
    %8 = arith.truncf %7 : vector<32x128xf32> to vector<32x128xbf16>
    %c0_6 = arith.constant 0 : index
    %c0_7 = arith.constant 0 : index
    %9 = vector.load %arg4[%c0_6, %c0_7] : memref<128x128xbf16, #tpu.memory_space<vmem>>, vector<128x128xbf16>
    %cst_8 = arith.constant dense<0.000000e+00> : vector<32x128xf32>
    %10 = tpu.matmul %8, %9, %cst_8 {dimension_numbers = #tpu.dot_dimension_numbers<[1], [0], [0], [1], [0, 0, 1, 1], [], []>} : vector<32x128xbf16>, vector<128x128xbf16>, vector<32x128xf32> -> vector<32x128xf32>
    %c0_9 = arith.constant 0 : index
    %c0_10 = arith.constant 0 : index
    %11 = vector.load %arg5[%c0_9, %c0_10] : memref<1x128xf32, #tpu.memory_space<vmem>>, vector<1x128xf32>
    %12 = vector.broadcast %11 : vector<1x128xf32> to vector<32x128xf32>
    %13 = arith.addf %10, %12 : vector<32x128xf32>
    %14 = arith.truncf %13 : vector<32x128xf32> to vector<32x128xbf16>
    %c0_11 = arith.constant 0 : index
    %c0_12 = arith.constant 0 : index
    %15 = vector.load %arg6[%c0_11, %c0_12] : memref<32x128xbf16, #tpu.memory_space<vmem>>, vector<32x128xbf16>
    tpu.vector_store %arg6[%c0_11, %c0_12], %14 {strides = array<i32>} : memref<32x128xbf16, #tpu.memory_space<vmem>>, vector<32x128xbf16>,
    return
  }
  func.func @transform_0(%arg0: i32) -> (i32, i32) {
    %c0_i32 = arith.constant 0 : i32
    %c0_i32_0 = arith.constant 0 : i32
    return %arg0, %c0_i32 : i32, i32
  }
  func.func @transform_1(%arg0: i32) -> (i32, i32) {
    %c0_i32 = arith.constant 0 : i32
    %c0_i32_0 = arith.constant 0 : i32
    %c0_i32_1 = arith.constant 0 : i32
    return %c0_i32, %c0_i32_0 : i32, i32
  }
  func.func @transform_2(%arg0: i32) -> (i32, i32) {
    %c0_i32 = arith.constant 0 : i32
    %c0_i32_0 = arith.constant 0 : i32
    %c0_i32_1 = arith.constant 0 : i32
    return %c0_i32, %c0_i32_0 : i32, i32
  }
  func.func @transform_3(%arg0: i32) -> (i32, i32) {
    %c0_i32 = arith.constant 0 : i32
    %c0_i32_0 = arith.constant 0 : i32
    %c0_i32_1 = arith.constant 0 : i32
    return %c0_i32, %c0_i32_0 : i32, i32
  }
  func.func @transform_4(%arg0: i32) -> (i32, i32) {
    %c0_i32 = arith.constant 0 : i32
    %c0_i32_0 = arith.constant 0 : i32
    %c0_i32_1 = arith.constant 0 : i32
    return %c0_i32, %c0_i32_0 : i32, i32
  }
  func.func @transform_5(%arg0: i32) -> (i32, i32) {
    %c0_i32 = arith.constant 0 : i32
    %c0_i32_0 = arith.constant 0 : i32
    return %arg0, %c0_i32 : i32, i32
  }
}

</mosaic_0001>

<bundles_post_ra>
// kernel: tpu_custom_call.1
= control target key start
LH: loop header
LB: loop body
LE: loop exit
PB: predicated region body
PF: predicated region fallthrough
CT: control target
= control target key end

     0   :  { %10 = vsyncpa [#allocation3], 0  ;;  %s689_s0 = inlined_call_operand.hbm [shape: bf16[32,128], index: 0, kind: input, shape index: {}]   ;;  %s690_s1 = inlined_call_operand.hbm [shape: bf16[128,128], index: 1, kind: input, shape index: {}]   ;;  %s691_s2 = inlined_call_operand.vmem [shape: f32[1,128], index: 2, kind: input, shape index: {}]   ;;  %s692_s3 = inlined_call_operand.hbm [shape: bf16[128,128], index: 3, kind: input, shape index: {}]   ;;  %s693_s4 = inlined_call_operand.vmem [shape: f32[1,128], index: 4, kind: input, shape index: {}]   ;;  %s694_s5 = inlined_call_operand.hbm [shape: bf16[32,128], index: 5, kind: output, shape index: {}]  }
   0x1   :  { %11 = vsyncpa [#allocation6], 0 }
   0x2   :  { %12 = vsyncpa [#allocation4], 0  ;;  %s580_s18 = smov [#allocation5]   ;;  %s581_s20 = smov [#allocation2]  }
   0x3   :  { %s30_s19 = sshll.u32 %s580_s18, 4  ;;  %s18_s21 = sshll.u32 %s581_s20, 4  ;;  %s31_s19 = int_to_ptr.vmem [resolvable:$true] %s30_s19  ;;  %s616_s21 = int_to_ptr.vmem [resolvable:$true] %s18_s21 }
   0x4   :  { %s486_s24 = scalar_lea.hbm %s690_s1, 1024 }
   0x5   :  { %p487_p0 = scmp.ne.s32.totalorder %s690_s1, %s486_s24  ;;  %p490_p1 = scmp.lt.u32.totalorder %s486_s24, %s690_s1 }
   0x7   :  { %p492_p2 = pnand %p490_p1, %p487_p0 }
   0x9   :  { %495 = shalt.err (!%p492_p2)
}
   0xa   :  { %s496_s29 = scalar_lea.vmem %s31_s19, 1024  ;;  %p501_p4 = scmp.lt.s32.totalorder %s31_s19, %s31_s19 }
   0xb   :  { %p497_p3 = scmp.ne.s32.totalorder %s31_s19, %s496_s29  ;;  %p502_p5 = scmp.lt.s32.totalorder %s496_s29, %s496_s29 }
   0xd   :  { %p503_p6 = por %p502_p5, %p501_p4 }
   0xf   :  { %p504_p7 = pnand %p503_p6, %p497_p3 }
  0x11   :  { %507 = shalt.err (!%p504_p7)
}
  0x12   :  { %s582_s30 = smov 64   ;;  %s583_s6 = smov 4  }
  0x13   :  { %36 = dma.hbm_to_vmem [thread:$0]  %s690_s1, 1024, %s31_s19, [#allocation6], %s582_s30, %s582_s30, %s583_s6  }
  0x14   :  { %s508_s11 = scalar_lea.hbm %s689_s0, 256 }
  0x15   :  { %p509_p8 = scmp.ne.s32.totalorder %s689_s0, %s508_s11  ;;  %p512_p9 = scmp.lt.u32.totalorder %s508_s11, %s689_s0 }
  0x17   :  { %p514_p10 = pnand %p512_p9, %p509_p8 }
  0x19   :  { %517 = shalt.err (!%p514_p10)
}
  0x1a   :  { %s518_s16 = scalar_lea.vmem %s616_s21, 256  ;;  %p523_p12 = scmp.lt.s32.totalorder %s616_s21, %s616_s21 }
  0x1b   :  { %p519_p11 = scmp.ne.s32.totalorder %s616_s21, %s518_s16  ;;  %p524_p13 = scmp.lt.s32.totalorder %s518_s16, %s518_s16 }
  0x1d   :  { %p525_p0 = por %p524_p13, %p523_p12 }
  0x1f   :  { %p526_p1 = pnand %p525_p0, %p519_p11 }
  0x21   :  { %529 = shalt.err (!%p526_p1)
}
  0x22   :  { %24 = dma.hbm_to_vmem [thread:$0]  %s689_s0, 256, %s616_s21, [#allocation3], %s582_s30, %s582_s30, %s583_s6  }
  0x23   :  { %s584_s18 = smov [#allocation7]   ;;  %s530_s23 = scalar_lea.hbm %s692_s3, 1024 }
  0x24   :  { %s44_s19 = sshll.u32 %s584_s18, 4  ;;  %p531_p2 = scmp.ne.s32.totalorder %s692_s3, %s530_s23  ;;  %s45_s19 = int_to_ptr.vmem [resolvable:$true] %s44_s19 }
  0x25   :  { %p534_p3 = scmp.lt.u32.totalorder %s530_s23, %s692_s3 }
  0x27   :  { %p536_p4 = pnand %p534_p3, %p531_p2 }
  0x29   :  { %539 = shalt.err (!%p536_p4)
}
  0x2a   :  { %s540_s28 = scalar_lea.vmem %s45_s19, 1024  ;;  %p545_p6 = scmp.lt.s32.totalorder %s45_s19, %s45_s19 }
  0x2b   :  { %p541_p5 = scmp.ne.s32.totalorder %s45_s19, %s540_s28  ;;  %p546_p7 = scmp.lt.s32.totalorder %s540_s28, %s540_s28 }
  0x2d   :  { %p547_p8 = por %p546_p7, %p545_p6 }
  0x2f   :  { %p548_p9 = pnand %p547_p8, %p541_p5 }
  0x31   :  { %551 = shalt.err (!%p548_p9)
}
  0x32   :  { %50 = dma.hbm_to_vmem [thread:$0]  %s692_s3, 1024, %s45_s19, [#allocation6], %s582_s30, %s582_s30, %s583_s6  }
  0x33   :  { %574 = dma.done.wait [#allocation3], 256  }
  0x34   :  { %575 = vsyncadd [#allocation3], 4294967040 }
  0x35   :  { %576 = dma.done.wait [#allocation6], 2048  }
  0x36   :  { %577 = vsyncadd [#allocation6], 4294965248  ;;  %v468_v0 = vld [vmem:[#allocation5] sm:$0xff]   ;;  %v469_v1 = vld [vmem:[#allocation5 + $0x8] sm:$0xff]  }
  0x37   :  { %422 = vmatprep.subr.bf16.mxu0 %v468_v0  ;;  %v470_v2 = vld [vmem:[#allocation5 + $0x10] sm:$0xff]   ;;  %v471_v3 = vld [vmem:[#allocation5 + $0x18] sm:$0xff]   ;;  %v478_v5 = vld [vmem:[#allocation7] sm:$0xff]  }
  0x38   :  { %423 = vmatpush3.bf16.msra.mxu0 %v468_v0  ;;  %v476_v4 = vld [vmem:[#allocation2] sm:$0xff]   ;;  %v479_v6 = vld [vmem:[#allocation7 + $0x8] sm:$0xff]   ;;  %v472_v7 = vld [vmem:[#allocation5 + $0x20] sm:$0xff]   ;;  %442 = vmatprep.subr.bf16.mxu1 %v478_v5 }
  0x39   :  { %424 = vmatprep.subr.bf16.mxu0 %v469_v1  ;;  %438 = vmatprep.mubr.bf16.mxu0 %v476_v4  ;;  %v480_v8 = vld [vmem:[#allocation7 + $0x10] sm:$0xff]   ;;  %v473_v9 = vld [vmem:[#allocation5 + $0x28] sm:$0xff]   ;;  %v481_v10 = vld [vmem:[#allocation7 + $0x18] sm:$0xff]  }
  0x3a   :  { %443 = vmatpush3.bf16.msra.mxu1 %v478_v5  ;;  %v474_v11 = vld [vmem:[#allocation5 + $0x30] sm:$0xff]   ;;  %v482_v12 = vld [vmem:[#allocation7 + $0x20] sm:$0xff]   ;;  %v475_v13 = vld [vmem:[#allocation5 + $0x38] sm:$0xff]  }
  0x3b   :  { %444 = vmatprep.subr.bf16.mxu1 %v479_v6  ;;  %v483_v14 = vld [vmem:[#allocation7 + $0x28] sm:$0xff]   ;;  %v477_v15 = vld [vmem:[#allocation2 + $0x8] sm:$0xff]   ;;  %v484_v16 = vld [vmem:[#allocation7 + $0x30] sm:$0xff]  }
  0x3c   :  { %425 = vmatpush3.bf16.msra.mxu0 %v469_v1  ;;  %v485_v17 = vld [vmem:[#allocation7 + $0x38] sm:$0xff]   ;;  %v363_v18 = vld [vmem:[%s691_s2] ss:$0 sm:$0xff]  ;;  %s585_s2 = smov [#allocation8]  }
  0x3d   :  { %426 = vmatprep.subr.bf16.mxu0 %v470_v2  ;;  %v374_v34 = vld [vmem:[%s693_s4] ss:$0 sm:$0xff]  ;;  %s350_s9 = sshll.u32 %s585_s2, 4  ;;  %s351_s9 = int_to_ptr.vmem [resolvable:$true] %s350_s9 }
  0x3e   :  { %445 = vmatpush3.bf16.msra.mxu1 %v479_v6  ;;  %s552_s10 = scalar_lea.vmem %s351_s9, 256  ;;  %p557_p11 = scmp.lt.s32.totalorder %s351_s9, %s351_s9 }
  0x3f   :  { %446 = vmatprep.subr.bf16.mxu1 %v480_v8  ;;  %p553_p10 = scmp.ne.s32.totalorder %s351_s9, %s552_s10  ;;  %p558_p12 = scmp.lt.s32.totalorder %s552_s10, %s552_s10 }
  0x40   :  { %427 = vmatpush3.bf16.msra.mxu0 %v470_v2 }
  0x41   :  { %428 = vmatprep.subr.bf16.mxu0 %v471_v3  ;;  %p559_p13 = por %p558_p12, %p557_p11 }
  0x42   :  { %447 = vmatpush3.bf16.msra.mxu1 %v480_v8 }
  0x43   :  { %448 = vmatprep.subr.bf16.mxu1 %v481_v10  ;;  %p560_p0 = pnand %p559_p13, %p553_p10 }
  0x44   :  { %429 = vmatpush3.bf16.msra.mxu0 %v471_v3 }
  0x45   :  { %430 = vmatprep.subr.bf16.mxu0 %v472_v7 }
  0x46   :  { %449 = vmatpush3.bf16.msra.mxu1 %v481_v10 }
  0x47   :  { %450 = vmatprep.subr.bf16.mxu1 %v482_v12 }
  0x48   :  { %431 = vmatpush3.bf16.msra.mxu0 %v472_v7 }
  0x49   :  { %432 = vmatprep.subr.bf16.mxu0 %v473_v9 }
  0x4a   :  { %451 = vmatpush3.bf16.msra.mxu1 %v482_v12 }
  0x4b   :  { %452 = vmatprep.subr.bf16.mxu1 %v483_v14 }
  0x4c   :  { %433 = vmatpush3.bf16.msra.mxu0 %v473_v9 }
  0x4d   :  { %434 = vmatprep.subr.bf16.mxu0 %v474_v11 }
  0x4e   :  { %453 = vmatpush3.bf16.msra.mxu1 %v483_v14 }
  0x4f   :  { %454 = vmatprep.subr.bf16.mxu1 %v484_v16 }
  0x50   :  { %435 = vmatpush3.bf16.msra.mxu0 %v474_v11 }
  0x51   :  { %436 = vmatprep.subr.bf16.mxu0 %v475_v13 }
  0x52   :  { %455 = vmatpush3.bf16.msra.mxu1 %v484_v16 }
  0x53   :  { %456 = vmatprep.subr.bf16.mxu1 %v485_v17 }
  0x54   :  { %437 = vmatpush3.bf16.msra.mxu0 %v475_v13 }
  0x56   :  { %457 = vmatpush3.bf16.msra.mxu1 %v485_v17 }
  0x57   :  { %439 = vmatmul.mubr.bf16.vlgmr.msra.gmra.mrb[0].mxu0 %v477_v15 }
 0x12a   :  { %v440_v19 = vpop.f32.mrb[0].mxu0 }
 0x12b   :  { %v193_v20 = vadd.f32 %v440_v19, %v363_v18  ;;  %v184_v21 = vpop.f32.mrb[1].mxu0 }
 0x12c   :  { %v185_v22 = vadd.f32 %v363_v18, %v184_v21  ;;  %v441_v23 = vpop.f32.mrb[2].mxu0 }
 0x12d   :  { %v196_v24 = vadd.f32 %v441_v23, %v363_v18  ;;  %v187_v25 = vpop.f32.mrb[3].mxu0  ;;  %v201_v27 = vmax.f32 %v193_v20, 0.0 }
 0x12e   :  { %v188_v26 = vadd.f32 %v363_v18, %v187_v25  ;;  %v199_v29 = vmax.f32 %v185_v22, 0.0 }
 0x12f   :  { %v202_v28 = vmax.f32 %v196_v24, 0.0 }
 0x130   :  { %v200_v30 = vmax.f32 %v188_v26, 0.0 }
 0x131   :  { %v204_v31 = vpack.c.bf16 %v202_v28, %v201_v27 }
 0x132   :  { %v203_v32 = vpack.c.bf16 %v200_v30, %v199_v29 }
 0x134   :  { %458 = vmatprep.mubr.bf16.mxu1 %v203_v32 }
 0x135   :  { %459 = vmatmul.mubr.bf16.vlgmr.msra.gmra.mrb[0].mxu1 %v204_v31 }
 0x208   :  { %v460_v33 = vpop.f32.mrb[0].mxu1 }
 0x209   :  { %v310_v35 = vpop.f32.mrb[1].mxu1  ;;  %v319_v37 = vadd.f32 %v460_v33, %v374_v34 }
 0x20a   :  { %v461_v36 = vpop.f32.mrb[2].mxu1  ;;  %v311_v40 = vadd.f32 %v374_v34, %v310_v35 }
 0x20b   :  { %v322_v38 = vadd.f32 %v461_v36, %v374_v34  ;;  %v313_v39 = vpop.f32.mrb[3].mxu1 }
 0x20c   :  { %v314_v41 = vadd.f32 %v374_v34, %v313_v39 }
 0x20d   :  { %v399_v42 = vpack.c.bf16 %v322_v38, %v319_v37 }
 0x20e   :  { %v394_v43 = vpack.c.bf16 %v314_v41, %v311_v40 }
 0x20f   :  { %401 = vst [vmem:[#allocation8 + $0x8] sm:$0xff] %v399_v42  }
 0x210   :  { %395 = vst [vmem:[#allocation8] sm:$0xff] %v394_v43  }
 0x211   :  { %563 = shalt.err (!%p560_p0)
}
 0x212   :  { %s564_s12 = scalar_lea.hbm %s694_s5, 256 }
 0x213   :  { %p565_p1 = scmp.ne.s32.totalorder %s694_s5, %s564_s12  ;;  %p568_p2 = scmp.lt.u32.totalorder %s564_s12, %s694_s5 }
 0x215   :  { %p570_p3 = pnand %p568_p2, %p565_p1 }
 0x217   :  { %573 = shalt.err (!%p570_p3)
}
 0x218   :  { %356 = dma.vmem_to_hbm [thread:$0]  %s351_s9, 256, %s694_s5, [#allocation4], %s582_s30, %s582_s30, %s583_s6  }
 0x219   :  { %578 = dma.done.wait [#allocation4], 256  }
 0x21a   :  { %579 = vsyncadd [#allocation4], 4294967040 }
 0x21b   :  { %360 = vsyncpa [#allocation3], 1 }
 0x21c   :  { %361 = vsyncpa [#allocation6], 1 }
 0x21d   :  { %362 = vsyncpa [#allocation4], 1 }

</bundles_post_ra>
